<compile_context>
chip_gen: v7x
topology: tpu7x:2x2x1
jax: 0.10.0
libtpu: 0.0.40
codegen_flags: <defaults>
</compile_context>

<pallas_src>
import math

import jax
import jax.numpy as jnp
from jax.experimental import pallas as pl
from jax.experimental.pallas import tpu as pltpu

KERNEL_SIZES = (1, 2, 4, 6, 12)
NUM_K = len(KERNEL_SIZES)


def _compute_new_rel_offsets():
    """Relative shifts d (s_d[i] = x[clip(i+d, 0, T-1)]) that newly enter each
    nested moving-average window (1 ⊂ 2 ⊂ 4 ⊂ 6 ⊂ 12)."""
    prev = frozenset()
    out = []
    for k in KERNEL_SIZES:
        cur = frozenset(range(-(k // 2), -(k // 2) + k))
        assert prev <= cur, "windows must be nested for the incremental sum"
        out.append(tuple(sorted(cur - prev)))
        prev = cur
    return tuple(out)


_NEW_REL_OFFSETS = _compute_new_rel_offsets()
# ((0,), (-1,), (-2, 1), (-3, 2), (-6, -5, -4, 3, 4, 5))


# ----------------------------- kernels ------------------------------------ #

def _detrend_kernel(x_ref, aw_ref, ab_ref, w_ref, b_ref, trend_ref):
    # x_ref: (T, LN) lane-dense block of the (T, B*C) series (f32, VMEM)
    # aw_ref/ab_ref: (1, LN) affine params tiled over the folded (B*C) lane axis
    # w_ref/b_ref: (NUM_K,) SMEM scalars of nn.Linear(1, NUM_K)
    # trend_ref: (T, LN) output; season = x - trend is computed in the wrapper.
    x = x_ref[...]
    T, LN = x.shape

    # Replicate-padding halo synthesized in-kernel (no HBM copy of a padded
    # array): shifted copy s_d[i] = x[clip(i+d, 0, T-1)] = sublane roll (XLU)
    # + boundary select against the broadcast first/last row (VPU).
    row = jax.lax.broadcasted_iota(jnp.int32, (T, LN), 0)
    first = jnp.broadcast_to(x[0:1], (T, LN))          # hoisted broadcasts
    last = jnp.broadcast_to(x[T - 1:T], (T, LN))

    def shifted(d):
        rolled = pltpu.roll(x, shift=(-d) % T, axis=0)  # out[i] = x[(i+d) % T]
        if d > 0:
            return jnp.where(row < T - d, rolled, last)
        return jnp.where(row >= -d, rolled, first)

    # Softmax logits of nn.Linear(1, NUM_K): logit_k = x*w_k + b_k.
    # Keep them live across both passes for small tiles (saves 5 FMAs/elem on
    # VALU-bound v7x); recompute for large tiles to avoid vreg spills (hidden
    # under the HBM roofline on v5e/v6e anyway).
    reuse = (T * LN) <= 8 * 1024
    logits = [x * w_ref[k] + b_ref[k] for k in range(NUM_K)] if reuse else None

    # pass 1: running max of the NUM_K logits (numerically stable softmax)
    m = logits[0] if reuse else x * w_ref[0] + b_ref[0]
    for k in range(1, NUM_K):
        lk = logits[k] if reuse else x * w_ref[k] + b_ref[k]
        m = jnp.maximum(m, lk)

    # pass 2: streamed softmax + incremental shifted-add window sums
    acc = jnp.zeros_like(x)
    denom = jnp.zeros_like(x)
    win = jnp.zeros_like(x)                            # running nested window sum
    for idx, (ksz, offs) in enumerate(zip(KERNEL_SIZES, _NEW_REL_OFFSETS)):
        for d in offs:
            win = win + (x if d == 0 else shifted(d))
        lg = logits[idx] if reuse else x * w_ref[idx] + b_ref[idx]
        e = jnp.exp(lg - m)                            # EUP
        acc = acc + win * (e * (1.0 / ksz))
        denom = denom + e

    # EUP reciprocal estimate + one Newton step (~f32 accurate, denom in [1, 5])
    inv = pl.reciprocal(denom, approx=True)
    inv = inv * (2.0 - denom * inv)

    trend_ref[...] = (acc * inv) * aw_ref[...] + ab_ref[...]


def _restore_kernel(x_ref, trend_ref, inv_ref, ab_ref, y_ref):
    # Pure elementwise; inv = 1/(affine_weight + eps^2) precomputed in wrapper.
    # TODO(synk): this path is a plain elementwise op XLA could also fuse; kept
    # as a lane-dense Pallas kernel per the task.
    y_ref[...] = x_ref[...] + (trend_ref[...] - ab_ref[...]) * inv_ref[...]


# ----------------------------- wrappers ------------------------------------ #

def _multi_tensorcore():
    """True on chips with 2 TensorCores per device (megacore / v7x); only those
    benefit from splitting the lane axis into >=2 parallel grid steps."""
    try:
        kind = jax.devices()[0].device_kind.lower()
        return ("v4" in kind) or ("v5p" in kind) or ("v7" in kind)
    except Exception:
        return False


def _pick_lane_block(T, padded_n, multi_core):
    """Largest 128-multiple lane block with a (T, LN) f32 tile <= ~4 MiB.
    On 2-TensorCore chips prefer the largest block that still gives >=2 grid
    steps; on single-TC chips take the single largest block (fewer grid steps
    = less fixed per-step overhead)."""
    cap = max(128, ((4 << 20) // (4 * max(T, 1))) // 128 * 128)
    cands = [c for c in (2048, 1024, 512, 256, 128)
             if c <= cap and padded_n % c == 0]
    if not cands:
        return 128
    if multi_core:
        for c in cands:
            if padded_n // c >= 2:
                return c
    return cands[0]


def _detrend_call(x, affine_weight, affine_bias, mlp_w, mlp_b):
    B, T, C = x.shape
    N = B * C
    padded_n = -(-N // 128) * 128
    LN = _pick_lane_block(T, padded_n, _multi_tensorcore())

    # (B,T,C) -> lane-dense (T, B*C), zero-pad lanes to a multiple of 128.
    # TODO(synk): for very long T add T-axis halo tiling (overlapping blocks) so
    # per-block VMEM stays bounded on v7x; untiled T is fine for typical lengths.
    xf = x.astype(jnp.float32)
    xt = jnp.transpose(xf, (1, 0, 2)).reshape(T, N)
    if padded_n != N:
        xt = jnp.pad(xt, ((0, 0), (0, padded_n - N)))

    aw_t = jnp.pad(jnp.tile(affine_weight.astype(jnp.float32), B),
                   (0, padded_n - N)).reshape(1, padded_n)
    ab_t = jnp.pad(jnp.tile(affine_bias.astype(jnp.float32), B),
                   (0, padded_n - N)).reshape(1, padded_n)

    trend_t = pl.pallas_call(
        _detrend_kernel,
        out_shape=jax.ShapeDtypeStruct((T, padded_n), jnp.float32),
        grid=(padded_n // LN,),
        in_specs=[
            pl.BlockSpec((T, LN), lambda j: (0, j)),
            pl.BlockSpec((1, LN), lambda j: (0, j)),
            pl.BlockSpec((1, LN), lambda j: (0, j)),
            pl.BlockSpec(memory_space=pltpu.MemorySpace.SMEM),   # mlp weight (5,)
            pl.BlockSpec(memory_space=pltpu.MemorySpace.SMEM),   # mlp bias   (5,)
        ],
        out_specs=pl.BlockSpec((T, LN), lambda j: (0, j)),
        compiler_params=pltpu.CompilerParams(
            dimension_semantics=("parallel",),
            vmem_limit_bytes=48 * 1024 * 1024),
    )(xt, aw_t, ab_t, mlp_w.astype(jnp.float32), mlp_b.astype(jnp.float32))

    trend = jnp.transpose(trend_t[:, :N].reshape(T, B, C), (1, 0, 2))
    season = xf - trend   # fused by XLA with the transpose-back; halves kernel stores
    return season, trend


def _restore_call(x, trend, affine_weight, affine_bias, eps_sq):
    B, T, C = x.shape
    total = B * T * C
    # Lane width: a multiple of both C (so per-channel constants tile as a
    # (1, L) row) and 128, widened toward 512 lanes for dense stores.
    L_base = C * 128 // math.gcd(C, 128)
    L = L_base * max(1, 512 // L_base)
    R = -(-total // L)
    # Block rows: multiple of 8, targeting ~4 MiB per (Rb, L) f32 block.
    max_rb = max(8, ((4 << 20) // (4 * L)) // 8 * 8)
    Rb = min(max_rb, -(-R // 8) * 8)
    R_pad = -(-R // Rb) * Rb
    pad = R_pad * L - total

    xf = jnp.pad(x.astype(jnp.float32).reshape(-1), (0, pad)).reshape(R_pad, L)
    tf = jnp.pad(trend.astype(jnp.float32).reshape(-1), (0, pad)).reshape(R_pad, L)
    inv = 1.0 / (affine_weight.astype(jnp.float32) + eps_sq)
    inv_t = jnp.tile(inv, L // C).reshape(1, L)
    ab_t = jnp.tile(affine_bias.astype(jnp.float32), L // C).reshape(1, L)

    y = pl.pallas_call(
        _restore_kernel,
        out_shape=jax.ShapeDtypeStruct((R_pad, L), jnp.float32),
        grid=(R_pad // Rb,),
        in_specs=[
            pl.BlockSpec((Rb, L), lambda i: (i, 0)),
            pl.BlockSpec((Rb, L), lambda i: (i, 0)),
            pl.BlockSpec((1, L), lambda i: (0, 0)),
            pl.BlockSpec((1, L), lambda i: (0, 0)),
        ],
        out_specs=pl.BlockSpec((Rb, L), lambda i: (i, 0)),
        compiler_params=pltpu.CompilerParams(
            dimension_semantics=("parallel",),
            vmem_limit_bytes=48 * 1024 * 1024),
    )(xf, tf, inv_t, ab_t)
    return y.reshape(-1)[:total].reshape(B, T, C)


detrend = jax.jit(_detrend_call)
restore = jax.jit(_restore_call)


class LearnableMovingAvgPallas:
    """JAX/Pallas port of LearnableMovingAvg's forward pass."""

    def __init__(self, num_features, eps=1e-5, affine=True, key=None):
        self.num_features = num_features
        self.eps = eps
        self.affine = affine
        # _init_params(): ones / zeros, exactly as the PyTorch module.
        self.affine_weight = jnp.ones((num_features,), jnp.float32)
        self.affine_bias = jnp.zeros((num_features,), jnp.float32)
        # nn.Linear(1, NUM_K) parameters, deterministic init (U(-1,1), fan_in=1).
        key = jax.random.PRNGKey(42) if key is None else key
        kw, kb = jax.random.split(key)
        self.mlp_w = jax.random.uniform(kw, (NUM_K,), jnp.float32, -1.0, 1.0)
        self.mlp_b = jax.random.uniform(kb, (NUM_K,), jnp.float32, -1.0, 1.0)

    def __call__(self, x, mode: str, trend=None):
        aw = self.affine_weight if self.affine else jnp.ones((self.num_features,), jnp.float32)
        ab = self.affine_bias if self.affine else jnp.zeros((self.num_features,), jnp.float32)
        if mode == 'deTrend':
            season, trend = detrend(x, aw, ab, self.mlp_w, self.mlp_b)
            return season, trend
        elif mode == 'restore':
            # PyTorch: trend = (trend - bias) / (weight + eps^2); y = trend + x
            eps_sq = jnp.float32(self.eps * self.eps) if self.affine else jnp.float32(0.0)
            y = restore(x, trend, aw, ab, eps_sq)
            return y, trend
        raise NotImplementedError


# ----------------------------- reference + main ----------------------------- #

def _reference_detrend(x, aw, ab, w, b):
    B, T, C = x.shape
    mas = []
    for k in KERNEL_SIZES:
        # PyTorch MovingAvg: front pad k//2, end pad (k-1)//2 (replicate), AvgPool1d(k, 1)
        idx = jnp.clip(jnp.arange(T)[:, None] + jnp.arange(k)[None, :] - k // 2, 0, T - 1)
        mas.append(jnp.mean(x[:, idx, :], axis=2))
    mas = jnp.stack(mas, axis=-1)                          # (B,T,C,NUM_K)
    logits = x[..., None] * w + b                          # Linear(1, NUM_K)
    wts = jax.nn.softmax(logits, axis=-1)
    trend = jnp.sum(mas * wts, axis=-1)
    trend = trend * aw + ab
    return x - trend, trend


if __name__ == "__main__":
    B, T, C = 2, 16, 8
    key = jax.random.PRNGKey(0)
    x = jax.random.normal(key, (B, T, C), jnp.float32)

    model = LearnableMovingAvgPallas(num_features=C)

    # deTrend mode
    season, trend = model(x, 'deTrend')
    jax.block_until_ready((season, trend))

    season_ref, trend_ref = _reference_detrend(
        x, model.affine_weight, model.affine_bias, model.mlp_w, model.mlp_b)
    assert jnp.allclose(trend, trend_ref, atol=1e-4, rtol=1e-4)
    assert jnp.allclose(season, season_ref, atol=1e-4, rtol=1e-4)

    # restore mode: should invert deTrend (affine weight=1, bias=0)
    y, _ = model(season, 'restore', trend=trend)
    jax.block_until_ready(y)
    assert jnp.allclose(y, x, atol=1e-3, rtol=1e-3)

    print("KERNEL_OK")
</pallas_src>

<mosaic_0001>
module attributes {stable_mosaic.version = 11 : i64} {
  func.func @_detrend_kernel(%arg0: i32, %arg1: memref<16x128xf32, #tpu.memory_space<vmem>>, %arg2: memref<1x128xf32, #tpu.memory_space<vmem>>, %arg3: memref<1x128xf32, #tpu.memory_space<vmem>>, %arg4: memref<5xf32, #tpu.memory_space<smem>>, %arg5: memref<5xf32, #tpu.memory_space<smem>>, %arg6: memref<16x128xf32, #tpu.memory_space<vmem>>) attributes {dimension_semantics = [#tpu.dimension_semantics<parallel>], iteration_bounds = array<i64: 1>, scalar_prefetch = 0 : i64, scratch_operands = 0 : i64, tpu.core_type = #tpu.core_type<tc>, window_params = [{transform_indices = @transform_0, window_bounds = array<i64: 16, 128>}, {transform_indices = @transform_1, window_bounds = array<i64: 1, 128>}, {transform_indices = @transform_2, window_bounds = array<i64: 1, 128>}, {transform_indices = @transform_3, window_bounds = array<i64: 5>}, {transform_indices = @transform_4, window_bounds = array<i64: 5>}, {transform_indices = @transform_5, window_bounds = array<i64: 16, 128>}]} {
    %c0 = arith.constant 0 : index
    %c0_0 = arith.constant 0 : index
    %0 = vector.load %arg1[%c0, %c0_0] : memref<16x128xf32, #tpu.memory_space<vmem>>, vector<16x128xf32>
    %1 = tpu.iota {dimensions = array<i32: 0>} : vector<16x128xi32>
    %2 = vector.extract_strided_slice %0 {offsets = [0, 0], sizes = [1, 128], strides = [1, 1]} : vector<16x128xf32> to vector<1x128xf32>
    %3 = vector.shape_cast %2 : vector<1x128xf32> to vector<1x128xf32>
    %4 = vector.broadcast %3 : vector<1x128xf32> to vector<16x128xf32>
    %5 = vector.extract_strided_slice %0 {offsets = [15, 0], sizes = [1, 128], strides = [1, 1]} : vector<16x128xf32> to vector<1x128xf32>
    %6 = vector.shape_cast %5 : vector<1x128xf32> to vector<1x128xf32>
    %7 = vector.broadcast %6 : vector<1x128xf32> to vector<16x128xf32>
    %c0_1 = arith.constant 0 : index
    %8 = memref.load %arg4[%c0_1] : memref<5xf32, #tpu.memory_space<smem>>
    %9 = vector.broadcast %8 : f32 to vector<16x128xf32>
    %10 = arith.mulf %0, %9 : vector<16x128xf32>
    %c0_2 = arith.constant 0 : index
    %11 = memref.load %arg5[%c0_2] : memref<5xf32, #tpu.memory_space<smem>>
    %12 = vector.broadcast %11 : f32 to vector<16x128xf32>
    %13 = arith.addf %10, %12 : vector<16x128xf32>
    %c1 = arith.constant 1 : index
    %14 = memref.load %arg4[%c1] : memref<5xf32, #tpu.memory_space<smem>>
    %15 = vector.broadcast %14 : f32 to vector<16x128xf32>
    %16 = arith.mulf %0, %15 : vector<16x128xf32>
    %c1_3 = arith.constant 1 : index
    %17 = memref.load %arg5[%c1_3] : memref<5xf32, #tpu.memory_space<smem>>
    %18 = vector.broadcast %17 : f32 to vector<16x128xf32>
    %19 = arith.addf %16, %18 : vector<16x128xf32>
    %c2 = arith.constant 2 : index
    %20 = memref.load %arg4[%c2] : memref<5xf32, #tpu.memory_space<smem>>
    %21 = vector.broadcast %20 : f32 to vector<16x128xf32>
    %22 = arith.mulf %0, %21 : vector<16x128xf32>
    %c2_4 = arith.constant 2 : index
    %23 = memref.load %arg5[%c2_4] : memref<5xf32, #tpu.memory_space<smem>>
    %24 = vector.broadcast %23 : f32 to vector<16x128xf32>
    %25 = arith.addf %22, %24 : vector<16x128xf32>
    %c3 = arith.constant 3 : index
    %26 = memref.load %arg4[%c3] : memref<5xf32, #tpu.memory_space<smem>>
    %27 = vector.broadcast %26 : f32 to vector<16x128xf32>
    %28 = arith.mulf %0, %27 : vector<16x128xf32>
    %c3_5 = arith.constant 3 : index
    %29 = memref.load %arg5[%c3_5] : memref<5xf32, #tpu.memory_space<smem>>
    %30 = vector.broadcast %29 : f32 to vector<16x128xf32>
    %31 = arith.addf %28, %30 : vector<16x128xf32>
    %c4 = arith.constant 4 : index
    %32 = memref.load %arg4[%c4] : memref<5xf32, #tpu.memory_space<smem>>
    %33 = vector.broadcast %32 : f32 to vector<16x128xf32>
    %34 = arith.mulf %0, %33 : vector<16x128xf32>
    %c4_6 = arith.constant 4 : index
    %35 = memref.load %arg5[%c4_6] : memref<5xf32, #tpu.memory_space<smem>>
    %36 = vector.broadcast %35 : f32 to vector<16x128xf32>
    %37 = arith.addf %34, %36 : vector<16x128xf32>
    %38 = arith.maximumf %13, %19 : vector<16x128xf32>
    %39 = arith.maximumf %38, %25 : vector<16x128xf32>
    %40 = arith.maximumf %39, %31 : vector<16x128xf32>
    %41 = arith.maximumf %40, %37 : vector<16x128xf32>
    %cst = arith.constant 0.000000e+00 : f32
    %42 = vector.broadcast %cst : f32 to vector<16x128xf32>
    %cst_7 = arith.constant 0.000000e+00 : f32
    %43 = vector.broadcast %cst_7 : f32 to vector<16x128xf32>
    %cst_8 = arith.constant 0.000000e+00 : f32
    %44 = vector.broadcast %cst_8 : f32 to vector<16x128xf32>
    %45 = arith.addf %44, %0 : vector<16x128xf32>
    %46 = arith.subf %13, %41 : vector<16x128xf32>
    %47 = math.exp %46 : vector<16x128xf32>
    %cst_9 = arith.constant 1.000000e+00 : f32
    %48 = vector.broadcast %cst_9 : f32 to vector<16x128xf32>
    %49 = arith.mulf %47, %48 : vector<16x128xf32>
    %50 = arith.mulf %45, %49 : vector<16x128xf32>
    %51 = arith.addf %42, %50 : vector<16x128xf32>
    %52 = arith.addf %43, %47 : vector<16x128xf32>
    %c1_i32 = arith.constant 1 : i32
    %53 = tpu.dynamic_rotate %0 by %c1_i32 dim 0 : vector<16x128xf32>, i32 -> vector<16x128xf32>
    %c1_i32_10 = arith.constant 1 : i32
    %54 = vector.broadcast %c1_i32_10 : i32 to vector<16x128xi32>
    %55 = arith.cmpi sge, %1, %54 : vector<16x128xi32>
    %56 = arith.select %55, %53, %4 : vector<16x128xi1>, vector<16x128xf32>
    %57 = arith.addf %45, %56 : vector<16x128xf32>
    %58 = arith.subf %19, %41 : vector<16x128xf32>
    %59 = math.exp %58 : vector<16x128xf32>
    %cst_11 = arith.constant 5.000000e-01 : f32
    %60 = vector.broadcast %cst_11 : f32 to vector<16x128xf32>
    %61 = arith.mulf %59, %60 : vector<16x128xf32>
    %62 = arith.mulf %57, %61 : vector<16x128xf32>
    %63 = arith.addf %51, %62 : vector<16x128xf32>
    %64 = arith.addf %52, %59 : vector<16x128xf32>
    %c2_i32 = arith.constant 2 : i32
    %65 = tpu.dynamic_rotate %0 by %c2_i32 dim 0 : vector<16x128xf32>, i32 -> vector<16x128xf32>
    %c2_i32_12 = arith.constant 2 : i32
    %66 = vector.broadcast %c2_i32_12 : i32 to vector<16x128xi32>
    %67 = arith.cmpi sge, %1, %66 : vector<16x128xi32>
    %68 = arith.select %67, %65, %4 : vector<16x128xi1>, vector<16x128xf32>
    %69 = arith.addf %57, %68 : vector<16x128xf32>
    %c15_i32 = arith.constant 15 : i32
    %70 = tpu.dynamic_rotate %0 by %c15_i32 dim 0 : vector<16x128xf32>, i32 -> vector<16x128xf32>
    %c15_i32_13 = arith.constant 15 : i32
    %71 = vector.broadcast %c15_i32_13 : i32 to vector<16x128xi32>
    %72 = arith.cmpi slt, %1, %71 : vector<16x128xi32>
    %73 = arith.select %72, %70, %7 : vector<16x128xi1>, vector<16x128xf32>
    %74 = arith.addf %69, %73 : vector<16x128xf32>
    %75 = arith.subf %25, %41 : vector<16x128xf32>
    %76 = math.exp %75 : vector<16x128xf32>
    %cst_14 = arith.constant 2.500000e-01 : f32
    %77 = vector.broadcast %cst_14 : f32 to vector<16x128xf32>
    %78 = arith.mulf %76, %77 : vector<16x128xf32>
    %79 = arith.mulf %74, %78 : vector<16x128xf32>
    %80 = arith.addf %63, %79 : vector<16x128xf32>
    %81 = arith.addf %64, %76 : vector<16x128xf32>
    %c3_i32 = arith.constant 3 : i32
    %82 = tpu.dynamic_rotate %0 by %c3_i32 dim 0 : vector<16x128xf32>, i32 -> vector<16x128xf32>
    %c3_i32_15 = arith.constant 3 : i32
    %83 = vector.broadcast %c3_i32_15 : i32 to vector<16x128xi32>
    %84 = arith.cmpi sge, %1, %83 : vector<16x128xi32>
    %85 = arith.select %84, %82, %4 : vector<16x128xi1>, vector<16x128xf32>
    %86 = arith.addf %74, %85 : vector<16x128xf32>
    %c14_i32 = arith.constant 14 : i32
    %87 = tpu.dynamic_rotate %0 by %c14_i32 dim 0 : vector<16x128xf32>, i32 -> vector<16x128xf32>
    %c14_i32_16 = arith.constant 14 : i32
    %88 = vector.broadcast %c14_i32_16 : i32 to vector<16x128xi32>
    %89 = arith.cmpi slt, %1, %88 : vector<16x128xi32>
    %90 = arith.select %89, %87, %7 : vector<16x128xi1>, vector<16x128xf32>
    %91 = arith.addf %86, %90 : vector<16x128xf32>
    %92 = arith.subf %31, %41 : vector<16x128xf32>
    %93 = math.exp %92 : vector<16x128xf32>
    %cst_17 = arith.constant 0.166666672 : f32
    %94 = vector.broadcast %cst_17 : f32 to vector<16x128xf32>
    %95 = arith.mulf %93, %94 : vector<16x128xf32>
    %96 = arith.mulf %91, %95 : vector<16x128xf32>
    %97 = arith.addf %80, %96 : vector<16x128xf32>
    %98 = arith.addf %81, %93 : vector<16x128xf32>
    %c6_i32 = arith.constant 6 : i32
    %99 = tpu.dynamic_rotate %0 by %c6_i32 dim 0 : vector<16x128xf32>, i32 -> vector<16x128xf32>
    %c6_i32_18 = arith.constant 6 : i32
    %100 = vector.broadcast %c6_i32_18 : i32 to vector<16x128xi32>
    %101 = arith.cmpi sge, %1, %100 : vector<16x128xi32>
    %102 = arith.select %101, %99, %4 : vector<16x128xi1>, vector<16x128xf32>
    %103 = arith.addf %91, %102 : vector<16x128xf32>
    %c5_i32 = arith.constant 5 : i32
    %104 = tpu.dynamic_rotate %0 by %c5_i32 dim 0 : vector<16x128xf32>, i32 -> vector<16x128xf32>
    %c5_i32_19 = arith.constant 5 : i32
    %105 = vector.broadcast %c5_i32_19 : i32 to vector<16x128xi32>
    %106 = arith.cmpi sge, %1, %105 : vector<16x128xi32>
    %107 = arith.select %106, %104, %4 : vector<16x128xi1>, vector<16x128xf32>
    %108 = arith.addf %103, %107 : vector<16x128xf32>
    %c4_i32 = arith.constant 4 : i32
    %109 = tpu.dynamic_rotate %0 by %c4_i32 dim 0 : vector<16x128xf32>, i32 -> vector<16x128xf32>
    %c4_i32_20 = arith.constant 4 : i32
    %110 = vector.broadcast %c4_i32_20 : i32 to vector<16x128xi32>
    %111 = arith.cmpi sge, %1, %110 : vector<16x128xi32>
    %112 = arith.select %111, %109, %4 : vector<16x128xi1>, vector<16x128xf32>
    %113 = arith.addf %108, %112 : vector<16x128xf32>
    %c13_i32 = arith.constant 13 : i32
    %114 = tpu.dynamic_rotate %0 by %c13_i32 dim 0 : vector<16x128xf32>, i32 -> vector<16x128xf32>
    %c13_i32_21 = arith.constant 13 : i32
    %115 = vector.broadcast %c13_i32_21 : i32 to vector<16x128xi32>
    %116 = arith.cmpi slt, %1, %115 : vector<16x128xi32>
    %117 = arith.select %116, %114, %7 : vector<16x128xi1>, vector<16x128xf32>
    %118 = arith.addf %113, %117 : vector<16x128xf32>
    %c12_i32 = arith.constant 12 : i32
    %119 = tpu.dynamic_rotate %0 by %c12_i32 dim 0 : vector<16x128xf32>, i32 -> vector<16x128xf32>
    %c12_i32_22 = arith.constant 12 : i32
    %120 = vector.broadcast %c12_i32_22 : i32 to vector<16x128xi32>
    %121 = arith.cmpi slt, %1, %120 : vector<16x128xi32>
    %122 = arith.select %121, %119, %7 : vector<16x128xi1>, vector<16x128xf32>
    %123 = arith.addf %118, %122 : vector<16x128xf32>
    %c11_i32 = arith.constant 11 : i32
    %124 = tpu.dynamic_rotate %0 by %c11_i32 dim 0 : vector<16x128xf32>, i32 -> vector<16x128xf32>
    %c11_i32_23 = arith.constant 11 : i32
    %125 = vector.broadcast %c11_i32_23 : i32 to vector<16x128xi32>
    %126 = arith.cmpi slt, %1, %125 : vector<16x128xi32>
    %127 = arith.select %126, %124, %7 : vector<16x128xi1>, vector<16x128xf32>
    %128 = arith.addf %123, %127 : vector<16x128xf32>
    %129 = arith.subf %37, %41 : vector<16x128xf32>
    %130 = math.exp %129 : vector<16x128xf32>
    %cst_24 = arith.constant 0.0833333358 : f32
    %131 = vector.broadcast %cst_24 : f32 to vector<16x128xf32>
    %132 = arith.mulf %130, %131 : vector<16x128xf32>
    %133 = arith.mulf %128, %132 : vector<16x128xf32>
    %134 = arith.addf %97, %133 : vector<16x128xf32>
    %135 = arith.addf %98, %130 : vector<16x128xf32>
    %136 = tpu.reciprocal %135 {approx = true} : vector<16x128xf32> -> vector<16x128xf32>
    %137 = arith.mulf %135, %136 : vector<16x128xf32>
    %cst_25 = arith.constant 2.000000e+00 : f32
    %138 = vector.broadcast %cst_25 : f32 to vector<16x128xf32>
    %139 = arith.subf %138, %137 : vector<16x128xf32>
    %140 = arith.mulf %136, %139 : vector<16x128xf32>
    %141 = arith.mulf %134, %140 : vector<16x128xf32>
    %c0_26 = arith.constant 0 : index
    %c0_27 = arith.constant 0 : index
    %142 = vector.load %arg2[%c0_26, %c0_27] : memref<1x128xf32, #tpu.memory_space<vmem>>, vector<1x128xf32>
    %143 = vector.broadcast %142 : vector<1x128xf32> to vector<16x128xf32>
    %144 = arith.mulf %141, %143 : vector<16x128xf32>
    %c0_28 = arith.constant 0 : index
    %c0_29 = arith.constant 0 : index
    %145 = vector.load %arg3[%c0_28, %c0_29] : memref<1x128xf32, #tpu.memory_space<vmem>>, vector<1x128xf32>
    %146 = vector.broadcast %145 : vector<1x128xf32> to vector<16x128xf32>
    %147 = arith.addf %144, %146 : vector<16x128xf32>
    %c0_30 = arith.constant 0 : index
    %c0_31 = arith.constant 0 : index
    %148 = vector.load %arg6[%c0_30, %c0_31] : memref<16x128xf32, #tpu.memory_space<vmem>>, vector<16x128xf32>
    tpu.vector_store %arg6[%c0_30, %c0_31], %147 {strides = array<i32>} : memref<16x128xf32, #tpu.memory_space<vmem>>, vector<16x128xf32>,
    return
  }
  func.func @transform_0(%arg0: i32) -> (i32, i32) {
    %c0_i32 = arith.constant 0 : i32
    %c0_i32_0 = arith.constant 0 : i32
    return %c0_i32, %arg0 : i32, i32
  }
  func.func @transform_1(%arg0: i32) -> (i32, i32) {
    %c0_i32 = arith.constant 0 : i32
    %c0_i32_0 = arith.constant 0 : i32
    return %c0_i32, %arg0 : i32, i32
  }
  func.func @transform_2(%arg0: i32) -> (i32, i32) {
    %c0_i32 = arith.constant 0 : i32
    %c0_i32_0 = arith.constant 0 : i32
    return %c0_i32, %arg0 : i32, i32
  }
  func.func @transform_3(%arg0: i32) -> i32 {
    %c0_i32 = arith.constant 0 : i32
    %c0_i32_0 = arith.constant 0 : i32
    return %c0_i32 : i32
  }
  func.func @transform_4(%arg0: i32) -> i32 {
    %c0_i32 = arith.constant 0 : i32
    %c0_i32_0 = arith.constant 0 : i32
    return %c0_i32 : i32
  }
  func.func @transform_5(%arg0: i32) -> (i32, i32) {
    %c0_i32 = arith.constant 0 : i32
    %c0_i32_0 = arith.constant 0 : i32
    return %c0_i32, %arg0 : i32, i32
  }
}

</mosaic_0001>

<bundles_post_ra>
// kernel: tile.14
= control target key start
LH: loop header
LB: loop body
LE: loop exit
PB: predicated region body
PF: predicated region fallthrough
CT: control target
= control target key end

     0   :  { %vm7_vm0 = vcmask 64512   ;;  %vm13_vm1 = vcmask 130112   ;;  %s39_s0 = inlined_call_operand.vmem [shape: f32[2,8], index: 0, kind: input, shape index: {}]   ;;  %s40_s1 = inlined_call_operand.vmem [shape: f32[16], index: 1, kind: output, shape index: {}]  }
   0x1   :  { %v4_v0 = vld [vmem:[%s39_s0] sm:$0x3]  ;;  %s22_s0 = smov 8  }
   0x2   :  { %5 = vst [vmem:[#allocation1] sm:$0x3] %v4_v0 }
   0x9   :  { %v10_v1 = vld [vmem:[#allocation1 + $0x1] sm:$0x1]   ;;  %v6_v2 = vld [vmem:[#allocation1] sm:$0x1]  }
   0xa   :  { %11 = vrot.lane.b32.xlu0 %v10_v1, %s22_s0  ;;  %8 = vst.msk [vmem:[#allocation0] sm:$0x1] %vm7_vm0, %v6_v2  }
  0x7c   :  { %v12_v3 = vpop.permute.xlu0 %11  }
  0x7d   :  { %14 = vst.msk [vmem:[#allocation0] sm:$0x1] %vm13_vm1, %v12_v3  }
  0x84   :  { %v18_v4 = vld [vmem:[#allocation0] sm:$0x1] }
  0x85   :  { %20 = vst [vmem:[%s40_s1] sm:$0x1] %v18_v4 }

// kernel: tile.13
= control target key start
LH: loop header
LB: loop body
LE: loop exit
PB: predicated region body
PF: predicated region fallthrough
CT: control target
= control target key end

     0   :  { %2 = vsyncpa [#allocation1], 0  ;;  %s44_s6 = smov [#allocation0]   ;;  %s70_s0 = inlined_call_operand.hbm [shape: f32[8], index: 0, kind: input, shape index: {}]   ;;  %s71_s1 = inlined_call_operand.vmem [shape: f32[2,8], index: 1, kind: output, shape index: {}]  }
   0x1   :  { %s9_s7 = sshll.u32 %s44_s6, 4  ;;  %s20_s10 = scalar_lea.hbm %s70_s0, 16  ;;  %s10_s7 = int_to_ptr.vmem [resolvable:$true] %s9_s7 }
   0x2   :  { %p21_p0 = scmp.ne.s32.totalorder %s70_s0, %s20_s10  ;;  %p24_p1 = scmp.lt.u32.totalorder %s20_s10, %s70_s0 }
   0x4   :  { %p26_p2 = pnand %p24_p1, %p21_p0 }
   0x6   :  { %29 = shalt.err (!%p26_p2)
}
   0x7   :  { %s30_s15 = scalar_lea.vmem %s10_s7, 16  ;;  %s34_s16 = scalar_lea.vmem %s10_s7, 32 }
   0x8   :  { %p31_p3 = scmp.ne.s32.totalorder %s10_s7, %s30_s15  ;;  %p35_p4 = scmp.lt.s32.totalorder %s10_s7, %s10_s7 }
   0x9   :  { %p36_p5 = scmp.lt.s32.totalorder %s34_s16, %s30_s15 }
   0xb   :  { %p37_p6 = por %p36_p5, %p35_p4 }
   0xd   :  { %p38_p7 = pnand %p37_p6, %p31_p3 }
   0xf   :  { %41 = shalt.err (!%p38_p7)
}
  0x10   :  { %12 = dma.hbm_to_vmem [thread:$0]  %s70_s0, 16, %s10_s7, [#allocation1]  }
  0x11   :  { %42 = dma.done.wait [#allocation1], 16  }
  0x12   :  { %43 = vsyncadd [#allocation1], 4294967280  ;;  %v16_v0 = vld [vmem:[#allocation0] ss:$0 sm:$0xff] }
  0x13   :  { %17 = vst [vmem:[%s71_s1] sm:$0x3] %v16_v0 }
  0x14   :  { %18 = vsyncpa [#allocation1], 1 }

// kernel: tile.18
= control target key start
LH: loop header
LB: loop body
LE: loop exit
PB: predicated region body
PF: predicated region fallthrough
CT: control target
= control target key end

     0   :  { %s22_s0 = inlined_call_operand.vmem [shape: f32[8], index: 0, kind: input, shape index: {}]   ;;  %s23_s1 = inlined_call_operand.vmem [shape: f32[2,8], index: 1, kind: output, shape index: {}]  }
   0x1   :  { %v4_v0 = vld [vmem:[%s22_s0] ss:$0 sm:$0xff] }
   0x2   :  { %5 = vst [vmem:[%s23_s1] sm:$0x3] %v4_v0 }

// kernel: _detrend_call.1
= control target key start
LH: loop header
LB: loop body
LE: loop exit
PB: predicated region body
PF: predicated region fallthrough
CT: control target
= control target key end

     0   :  { %10 = vsyncpa [#allocation3], 0  ;;  %s610_s0 = inlined_call_operand.vmem [shape: f32[16,128], index: 0, kind: input, shape index: {}]   ;;  %s611_s1 = inlined_call_operand.vmem [shape: f32[1,128], index: 1, kind: input, shape index: {}]   ;;  %s612_s2 = inlined_call_operand.vmem [shape: f32[1,128], index: 2, kind: input, shape index: {}]   ;;  %s613_s3 = inlined_call_operand.vmem [shape: f32[5], index: 3, kind: input, shape index: {}]   ;;  %s614_s4 = inlined_call_operand.vmem [shape: f32[5], index: 4, kind: input, shape index: {}]   ;;  %s615_s5 = inlined_call_operand.vmem [shape: f32[16,128], index: 5, kind: output, shape index: {}]  }
   0x1   :  { %s24_s20 = sshll.u32 %s613_s3, 4  ;;  %s25_s20 = int_to_ptr.vmem [resolvable:$true] %s24_s20 }
   0x2   :  { %11 = vsyncpa [#allocation5], 0  ;;  %s34_s23 = sshll.u32 %s614_s4, 4  ;;  %s349_s24 = scalar_lea.vmem %s25_s20, 16  ;;  %s35_s23 = int_to_ptr.vmem [resolvable:$true] %s34_s23 }
   0x3   :  { %p350_p0 = scmp.ne.s32.totalorder %s25_s20, %s349_s24  ;;  %p354_p1 = scmp.lt.s32.totalorder %s25_s20, %s25_s20 }
   0x4   :  { %p355_p2 = scmp.lt.s32.totalorder %s349_s24, %s349_s24 }
   0x6   :  { %p356_p3 = por %p355_p2, %p354_p1 }
   0x8   :  { %p357_p4 = pnand %p356_p3, %p350_p0 }
   0xa   :  { %360 = shalt.err (!%p357_p4)
}
   0xb   :  { %s377_s25 = smov [#allocation2]   ;;  %s361_s26 = scalar_lea.vmem %s35_s23, 16 }
   0xc   :  { %27 = dma.vmem_to_smem %s25_s20, 16, %s377_s25, [#allocation3]  }
   0xd   :  { %p362_p5 = scmp.ne.s32.totalorder %s35_s23, %s361_s26  ;;  %p366_p6 = scmp.lt.s32.totalorder %s35_s23, %s35_s23 }
   0xe   :  { %p367_p7 = scmp.lt.s32.totalorder %s361_s26, %s361_s26 }
  0x10   :  { %p368_p8 = por %p367_p7, %p366_p6 }
  0x12   :  { %p369_p9 = pnand %p368_p8, %p362_p5 }
  0x14   :  { %372 = shalt.err (!%p369_p9)
}
  0x15   :  { %s378_s3 = smov [#allocation4]  }
  0x16   :  { %37 = dma.vmem_to_smem %s35_s23, 16, %s378_s3, [#allocation5]  }
  0x17   :  { %373 = dma.done.wait [#allocation3], 16  }
  0x18   :  { %374 = vsyncadd [#allocation3], 4294967280 }
  0x19   :  { %375 = dma.done.wait [#allocation5], 16  }
  0x1a   :  { %376 = vsyncadd [#allocation5], 4294967280 }
  0x1b   :  { %44 = sfence }
  0x1c   :  { %s58_s4 = sld [smem:[#allocation2]]  ;;  %s313_s28 = sld [smem:[#allocation2 + $0x1]]  ;;  %v47_v0 = vlaneseq  ;;  %v420_v1 = vld [vmem:[%s610_s0] sm:$0xff]  ;;  %v425_v2 = vld [vmem:[%s610_s0 + $0x8] sm:$0xff] }
  0x1d   :  { %s62_s27 = sld [smem:[#allocation4]]  ;;  %s314_s29 = sld [smem:[#allocation4 + $0x1]]  ;;  %v120_v38 = vrot.slane %v420_v1, 7  ;;  %v121_v39 = vrot.slane %v425_v2, 7  ;;  %v145_v44 = vrot.slane %v420_v1, 6  ;;  %v146_v47 = vrot.slane %v425_v2, 6 }
  0x1e   :  { %s315_s30 = sld [smem:[#allocation2 + $0x2]]  ;;  %s317_s7 = sld [smem:[#allocation2 + $0x3]]  ;;  %v431_v3 = vshrl.u32 %v47_v0, 7  ;;  %v156_v53 = vrot.slane %v420_v1, 1  ;;  %v157_v56 = vrot.slane %v425_v2, 1 }
  0x1f   :  { %s316_s6 = sld [smem:[#allocation4 + $0x2]]  ;;  %s415_s8 = sld [smem:[#allocation4 + $0x3]] }
  0x20   :  { %s427_s13 = sld [smem:[#allocation2 + $0x4]]  ;;  %v52_v34 = vsub.s32 0, %v431_v3  ;;  %vm122_vm0 = vcmp.lt.s32.totalorder %v431_v3, 1  ;;  %vm125_vm1 = vcmp.ge.s32.totalorder %v431_v3, 1  ;;  %vm147_vm2 = vcmp.lt.s32.totalorder %v431_v3, 2 }
  0x21   :  { %s429_s14 = sld [smem:[#allocation4 + $0x4]]  ;;  %v124_v46 = vsel %vm122_vm0, %v121_v39, %v120_v38  ;;  %v123_v49 = vsel %vm122_vm0, %v120_v38, %v121_v39  ;;  %v483_v50 = vadd.s32 8, %v431_v3  ;;  %v56_v51 = vsub.s32 7, %v431_v3 }
  0x22   :  { %v59_v4 = vstv %s58_s4  ;;  %v67_v8 = vstv %s313_s28  ;;  %v470_v43 = vrot.slane %v420_v1, %v52_v34  ;;  %v149_v55 = vsel %vm147_vm2, %v146_v47, %v145_v44 }
  0x23   :  { %v63_v5 = vstv %s62_s27  ;;  %v60_v6 = vmul.f32 %v59_v4, %v420_v1  ;;  %v61_v7 = vmul.f32 %v59_v4, %v425_v2  ;;  %v71_v9 = vstv %s314_s29 }
  0x24   :  { %v68_v10 = vmul.f32 %v67_v8, %v420_v1  ;;  %v69_v11 = vmul.f32 %v67_v8, %v425_v2  ;;  %v75_v12 = vstv %s315_s30  ;;  %v83_v20 = vstv %s317_s7 }
  0x25   :  { %v79_v13 = vstv %s316_s6  ;;  %v64_v14 = vadd.f32 %v63_v5, %v60_v6  ;;  %v65_v15 = vadd.f32 %v63_v5, %v61_v7  ;;  %v76_v16 = vmul.f32 %v75_v12, %v420_v1 }
  0x26   :  { %v77_v17 = vmul.f32 %v75_v12, %v425_v2  ;;  %v72_v18 = vadd.f32 %v71_v9, %v68_v10  ;;  %v439_v19 = vadd.f32 %v71_v9, %v69_v11  ;;  %v87_v21 = vstv %s415_s8 }
  0x27   :  { %v442_v22 = vadd.f32 %v79_v13, %v76_v16  ;;  %v84_v24 = vmul.f32 %v83_v20, %v420_v1  ;;  %v85_v25 = vmul.f32 %v83_v20, %v425_v2  ;;  %v91_v26 = vstv %s427_s13 }
  0x28   :  { %v444_v23 = vadd.f32 %v79_v13, %v77_v17  ;;  %v95_v27 = vstv %s429_s14  ;;  %v98_v28 = vmax.f32 %v64_v14, %v72_v18  ;;  %v99_v29 = vmax.f32 %v65_v15, %v439_v19 }
  0x29   :  { %v451_v30 = vadd.f32 %v87_v21, %v84_v24  ;;  %v453_v31 = vadd.f32 %v87_v21, %v85_v25  ;;  %v92_v32 = vmul.f32 %v91_v26, %v420_v1  ;;  %v93_v33 = vmul.f32 %v91_v26, %v425_v2 }
  0x2a   :  { %v100_v35 = vmax.f32 %v98_v28, %v442_v22  ;;  %v101_v36 = vmax.f32 %v99_v29, %v444_v23  ;;  %v127_v52 = vsel %vm125_vm1, %v124_v46, %v470_v43  ;;  %vm150_vm3 = vcmp.ge.s32.totalorder %v431_v3, 2 }
  0x2b   :  { %v460_v37 = vadd.f32 %v95_v27, %v92_v32  ;;  %v466_v41 = vadd.f32 %v95_v27, %v93_v33  ;;  %v492_v57 = vadd.f32 %v123_v49, %v425_v2  ;;  %vm158_vm4 = vcmp.lt.s32.totalorder %v431_v3, 7 }
  0x2c   :  { %v102_v40 = vmax.f32 %v100_v35, %v451_v30  ;;  %v103_v42 = vmax.f32 %v101_v36, %v453_v31  ;;  %v497_v59 = vadd.f32 %v127_v52, %v420_v1  ;;  %v148_v60 = vsel %vm147_vm2, %v145_v44, %v146_v47 }
  0x2d   :  { %v500_v61 = vrot.slane %v425_v2, %v56_v51  ;;  %v152_v63 = vsel %vm150_vm3, %v149_v55, %v470_v43  ;;  %v160_v5 = vsel %vm158_vm4, %v157_v56, %v156_v53  ;;  %vm162_vm5 = vcmp.lt.s32.totalorder %v483_v50, 15 }
  0x2e   :  { %v474_v45 = vmax.f32 %v102_v40, %v460_v37  ;;  %v480_v48 = vmax.f32 %v103_v42, %v466_v41  ;;  %v155_v6 = vadd.f32 %v148_v60, %v492_v57  ;;  %v181_v7 = vrot.slane %v420_v1, 5 }
  0x2f   :  { %v182_v8 = vrot.slane %v425_v2, 5  ;;  %v154_v10 = vadd.f32 %v152_v63, %v497_v59  ;;  %v159_v11 = vsel %vm158_vm4, %v156_v53, %v157_v56  ;;  %vm183_vm6 = vcmp.lt.s32.totalorder %v431_v3, 3 }
  0x30   :  { %v108_v54 = vsub.f32 %v64_v14, %v474_v45  ;;  %v109_v58 = vsub.f32 %v65_v15, %v480_v48  ;;  %v131_v62 = vsub.f32 %v72_v18, %v474_v45  ;;  %v132_v4 = vsub.f32 %v439_v19, %v480_v48 }
  0x31   :  { %v164_v13 = vsel %vm162_vm5, %v160_v5, %v500_v61  ;;  %v167_v14 = vsub.f32 %v442_v22, %v474_v45  ;;  %v168_v15 = vsub.f32 %v444_v23, %v480_v48  ;;  %v523_v17 = vsel %vm183_vm6, %v182_v8, %v181_v7 }
  0x32   :  { %v110_v0 = vmul.f32 1.442695, %v108_v54  ;;  %v112_v9 = vmul.f32 1.442695, %v109_v58  ;;  %v133_v12 = vmul.f32 1.442695, %v131_v62  ;;  %v528_v20 = vadd.f32 %v159_v11, %v154_v10 }
  0x33   :  { %v135_v16 = vmul.f32 1.442695, %v132_v4  ;;  %vm186_vm7 = vcmp.ge.s32.totalorder %v431_v3, 3  ;;  %v192_v18 = vrot.slane %v420_v1, 2  ;;  %v193_v19 = vrot.slane %v425_v2, 2 }
  0x34   :  { %325 = vpow2.f32 %v110_v0  ;;  %v530_v21 = vadd.f32 %v164_v13, %v155_v6  ;;  %vm194_vm8 = vcmp.lt.s32.totalorder %v431_v3, 6  ;;  %v169_v22 = vmul.f32 1.442695, %v167_v14 }
  0x35   :  { %327 = vpow2.f32 %v112_v9  ;;  %v171_v23 = vmul.f32 1.442695, %v168_v15  ;;  %v203_v24 = vsub.f32 %v451_v30, %v474_v45  ;;  %v537_v25 = vsel %vm183_vm6, %v181_v7, %v182_v8 }
  0x36   :  { %329 = vpow2.f32 %v133_v12  ;;  %v188_v26 = vsel %vm186_vm7, %v523_v17, %v470_v43  ;;  %v204_v27 = vsub.f32 %v453_v31, %v480_v48  ;;  %v196_v28 = vsel %vm194_vm8, %v193_v19, %v192_v18 }
  0x37   :  { %331 = vpow2.f32 %v135_v16  ;;  %vm198_vm9 = vcmp.lt.s32.totalorder %v483_v50, 14  ;;  %v190_v29 = vadd.f32 %v188_v26, %v528_v20  ;;  %v191_v30 = vadd.f32 %v537_v25, %v530_v21 }
  0x38   :  { %333 = vpow2.f32 %v169_v22  ;;  %v205_v32 = vmul.f32 1.442695, %v203_v24  ;;  %v195_v33 = vsel %vm194_vm8, %v192_v18, %v193_v19  ;;  %v200_v34 = vsel %vm198_vm9, %v196_v28, %v500_v61 }
  0x39   :  { %335 = vpow2.f32 %v171_v23  ;;  %v207_v35 = vmul.f32 1.442695, %v204_v27  ;;  %vm217_vm10 = vcmp.ge.s32.totalorder %v431_v3, 6  ;;  %v223_v31 = vrot.slane %v420_v1, 3 }
  0x3a   :  { %v224_v36 = vrot.slane %v425_v2, 3  ;;  %vm225_vm11 = vcmp.lt.s32.totalorder %v431_v3, 5  ;;  %v556_v39 = vadd.f32 %v195_v33, %v190_v29  ;;  %v558_v40 = vadd.f32 %v200_v34, %v191_v30 }
  0x3b   :  { %337 = vpow2.f32 %v205_v32  ;;  %v219_v44 = vsel %vm217_vm10, %v196_v28, %v470_v43  ;;  %vm228_vm12 = vcmp.ge.s32.totalorder %v431_v3, 5  ;;  %v234_v49 = vrot.slane %v420_v1, 4 }
  0x3c   :  { %339 = vpow2.f32 %v207_v35  ;;  %v227_v47 = vsel %vm225_vm11, %v224_v36, %v223_v31  ;;  %v235_v51 = vrot.slane %v425_v2, 4  ;;  %v263_v52 = vsub.f32 %v460_v37, %v474_v45 }
  0x3d   :  { %vm236_vm13 = vcmp.lt.s32.totalorder %v431_v3, 4  ;;  %v264_v54 = vsub.f32 %v466_v41, %v480_v48  ;;  %v221_v55 = vadd.f32 %v219_v44, %v556_v39  ;;  %v222_v56 = vadd.f32 %v558_v40, %v195_v33 }
  0x3e   :  { %v326_v38 = vpop.eup %325  ;;  %v265_v58 = vmul.f32 1.442695, %v263_v52  ;;  %v226_v62 = vsel %vm225_vm11, %v223_v31, %v224_v36  ;;  %v230_v63 = vsel %vm228_vm12, %v227_v47, %v470_v43  ;;  %v238_v45 = vsel %vm236_vm13, %v235_v51, %v234_v49 }
  0x3f   :  { %v328_v42 = vpop.eup %327  ;;  %v267_v0 = vmul.f32 1.442695, %v264_v54  ;;  %vm239_vm14 = vcmp.ge.s32.totalorder %v431_v3, 4  ;;  %v232_v48 = vadd.f32 %v230_v63, %v221_v55  ;;  %v233_v6 = vadd.f32 %v226_v62, %v222_v56 }
  0x40   :  { %v330_v46 = vpop.eup %329  ;;  %341 = vpow2.f32 %v265_v58  ;;  %v241_v7 = vsel %vm239_vm14, %v238_v45, %v470_v43  ;;  %v237_v10 = vsel %vm236_vm13, %v234_v49, %v235_v51  ;;  %vm246_vm15 = vcmp.lt.s32.totalorder %v483_v50, 13 }
  0x41   :  { %v332_v53 = vpop.eup %331  ;;  %v143_v60 = vadd.f32 %v330_v46, %v326_v38  ;;  %343 = vpow2.f32 %v267_v0  ;;  %v137_v12 = vmul.f32 0.5, %v330_v46  ;;  %v243_v13 = vadd.f32 %v241_v7, %v232_v48 }
  0x42   :  { %v334_v4 = vpop.eup %333  ;;  %v144_v37 = vadd.f32 %v332_v53, %v328_v42  ;;  %v138_v14 = vmul.f32 0.5, %v332_v53  ;;  %v244_v16 = vadd.f32 %v237_v10, %v233_v6  ;;  %v248_v19 = vsel %vm246_vm15, %v227_v47, %v500_v61 }
  0x43   :  { %v336_v41 = vpop.eup %335  ;;  %v179_v5 = vadd.f32 %v334_v4, %v143_v60  ;;  %v114_v22 = vmul.f32 %v326_v38, %v420_v1  ;;  %v139_v43 = vmul.f32 %v137_v12, %v497_v59  ;;  %vm252_vm0 = vcmp.lt.s32.totalorder %v483_v50, 12 }
  0x44   :  { %v180_v9 = vadd.f32 %v336_v41, %v144_v37  ;;  %v115_v3 = vmul.f32 %v328_v42, %v425_v2  ;;  %v173_v24 = vmul.f32 0.25, %v334_v4  ;;  %v249_v26 = vadd.f32 %v243_v13, %v226_v62 }
  0x45   :  { %v338_v8 = vpop.eup %337  ;;  %v140_v28 = vmul.f32 %v138_v14, %v492_v57  ;;  %v174_v29 = vmul.f32 0.25, %v336_v41  ;;  %v250_v30 = vadd.f32 %v248_v19, %v244_v16  ;;  %v254_v33 = vsel %vm252_vm0, %v238_v45, %v500_v61  ;;  %v322_v45 = vld [vmem:[%s612_s2] ss:$0 sm:$0xff] }
  0x46   :  { %v340_v11 = vpop.eup %339  ;;  %v215_v15 = vadd.f32 %v338_v8, %v179_v5  ;;  %v141_v35 = vadd.f32 %v139_v43, %v114_v22  ;;  %vm258_vm1 = vcmp.lt.s32.totalorder %v483_v50, 11  ;;  %v175_v1 = vmul.f32 %v173_v24, %v528_v20 }
  0x47   :  { %v216_v18 = vadd.f32 %v340_v11, %v180_v9  ;;  %v209_v59 = vmul.f32 0.16666667, %v338_v8  ;;  %v255_v31 = vadd.f32 %v249_v26, %v237_v10  ;;  %v142_v2 = vadd.f32 %v140_v28, %v115_v3 }
  0x48   :  { %v176_v36 = vmul.f32 %v174_v29, %v530_v21  ;;  %v210_v38 = vmul.f32 0.16666667, %v340_v11  ;;  %v256_v57 = vadd.f32 %v254_v33, %v250_v30  ;;  %v260_v42 = vsel %vm258_vm1, %v523_v17, %v500_v61 }
  0x49   :  { %v177_v44 = vadd.f32 %v175_v1, %v141_v35  ;;  %v211_v46 = vmul.f32 %v209_v59, %v556_v39  ;;  %v261_v47 = vadd.f32 %v255_v31, %v537_v25 }
  0x4a   :  { %v342_v23 = vpop.eup %341  ;;  %v178_v49 = vadd.f32 %v176_v36, %v142_v2  ;;  %v212_v20 = vmul.f32 %v210_v38, %v558_v40  ;;  %v262_v51 = vadd.f32 %v260_v42, %v256_v57  ;;  %v321_v40 = vld [vmem:[%s611_s1] ss:$0 sm:$0xff] }
  0x4b   :  { %v344_v27 = vpop.eup %343  ;;  %v275_v32 = vadd.f32 %v342_v23, %v215_v15  ;;  %v269_v50 = vmul.f32 0.083333336, %v342_v23  ;;  %v213_v53 = vadd.f32 %v211_v46, %v177_v44 }
  0x4c   :  { %v276_v34 = vadd.f32 %v344_v27, %v216_v18  ;;  %v270_v52 = vmul.f32 0.083333336, %v344_v27  ;;  %v214_v21 = vadd.f32 %v212_v20, %v178_v49 }
  0x4d   :  { %345 = vrcp.f32 %v275_v32  ;;  %v271_v54 = vmul.f32 %v269_v50, %v261_v47 }
  0x4e   :  { %347 = vrcp.f32 %v276_v34  ;;  %v272_v56 = vmul.f32 %v270_v52, %v262_v51 }
  0x4f   :  { %v273_v61 = vadd.f32 %v271_v54, %v213_v53 }
  0x50   :  { %v274_v63 = vadd.f32 %v272_v56, %v214_v21 }
  0x57   :  { %v346_v55 = vpop.eup %345 }
  0x58   :  { %v348_v58 = vpop.eup %347  ;;  %v279_v60 = vmul.f32 %v346_v55, %v275_v32 }
  0x59   :  { %v280_v62 = vmul.f32 %v348_v58, %v276_v34 }
  0x5a   :  { %v281_v17 = vsub.f32 2.0, %v279_v60 }
  0x5b   :  { %v282_v39 = vsub.f32 2.0, %v280_v62 }
  0x5c   :  { %v283_v0 = vmul.f32 %v346_v55, %v281_v17 }
  0x5d   :  { %v284_v25 = vmul.f32 %v348_v58, %v282_v39 }
  0x5e   :  { %v285_v4 = vmul.f32 %v283_v0, %v273_v61 }
  0x5f   :  { %v286_v37 = vmul.f32 %v284_v25, %v274_v63 }
  0x60   :  { %v294_v41 = vmul.f32 %v321_v40, %v285_v4 }
  0x61   :  { %v295_v48 = vmul.f32 %v321_v40, %v286_v37 }
  0x62   :  { %v303_v5 = vadd.f32 %v322_v45, %v294_v41 }
  0x63   :  { %v304_v6 = vadd.f32 %v322_v45, %v295_v48 }
  0x64   :  { %305 = vst [vmem:[%s615_s5] sm:$0xff] %v303_v5 }
  0x65   :  { %306 = vst [vmem:[%s615_s5 + $0x8] sm:$0xff] %v304_v6 }
  0x66   :  { %311 = vsyncpa [#allocation3], 1 }
  0x67   :  { %312 = vsyncpa [#allocation5], 1 }

</bundles_post_ra>
